<compile_context>
chip_gen: v7x
topology: tpu7x:2x2x1
jax: 0.10.0
libtpu: 0.0.40
codegen_flags: <defaults>
</compile_context>

<pallas_src>
import functools

import jax
import jax.numpy as jnp
from jax.experimental import pallas as pl
from jax.experimental.pallas import tpu as pltpu

_LANES = 128
_NEG_BIG = -1e30  # padded-class bias -> exp() underflows to exactly 0


def _round_up(n, m):
    return ((n + m - 1) // m) * m


def _mlp_softmax_kernel(x_ref, w1_ref, b1_ref, w2_ref, b2_ref, w3_ref, b3_ref, o_ref):
    # x arrives as f32 straight from HBM; cast to bf16 only for the MXU.
    x = x_ref[...].astype(jnp.bfloat16)                                 # [TB, D]

    # fc1 + relu (f32 accumulation / activation)
    h1 = jnp.dot(x, w1_ref[...], preferred_element_type=jnp.float32) + b1_ref[...]
    h1 = jnp.maximum(h1, 0.0)                                           # [TB, 128]

    # dropout1: identity (eval mode)

    # fc2 + relu
    h2 = jnp.dot(h1.astype(jnp.bfloat16), w2_ref[...],
                 preferred_element_type=jnp.float32) + b2_ref[...]
    h2 = jnp.maximum(h2, 0.0)                                           # [TB, 64]

    # dropout2: identity (eval mode)

    # fc3 (class axis padded to 128 lanes; padded classes biased to -1e30)
    logits = jnp.dot(h2.astype(jnp.bfloat16), w3_ref[...],
                     preferred_element_type=jnp.float32) + b3_ref[...]  # [TB, Cp]

    # softmax over the class axis; padded classes contribute exactly 0.
    m = jnp.max(logits, axis=-1, keepdims=True)
    e = jnp.exp(logits - m)
    denom = jnp.sum(e, axis=-1, keepdims=True)
    probs = e / denom                                                   # exact norm

    # Store only the real C classes (lane-masked store; output is unpadded).
    o_ref[...] = probs[:, : o_ref.shape[-1]].astype(o_ref.dtype)


def prepare_params(params):
    """One-time weight preprocessing (hoisted out of the per-call jitted path).

    Casts weights to bf16 for the MXU, keeps biases in f32, and pads only the
    class axis of fc3 to 128 lanes (zero weights, -1e30 bias).
    """
    H2, C = params["w3"].shape
    Cp = _round_up(C, _LANES)
    w3_p = jnp.zeros((H2, Cp), jnp.bfloat16).at[:, :C].set(
        params["w3"].astype(jnp.bfloat16))
    b3_p = jnp.full((1, Cp), _NEG_BIG, jnp.float32).at[:, :C].set(
        params["b3"].reshape(1, -1).astype(jnp.float32))
    return {
        "w1": params["w1"].astype(jnp.bfloat16),                     # [D, 128]
        "b1": params["b1"].reshape(1, -1).astype(jnp.float32),       # [1, 128]
        "w2": params["w2"].astype(jnp.bfloat16),                     # [128, 64]
        "b2": params["b2"].reshape(1, -1).astype(jnp.float32),       # [1, 64]
        "w3": w3_p,                                                  # [64, Cp]
        "b3": b3_p,                                                  # [1, Cp]
    }


@functools.partial(jax.jit, static_argnames=("num_classes", "tb"))
def sector_classifier_forward(x, prepared, *, num_classes, tb=4096):
    """x: [B, input_size] float32. prepared: output of prepare_params."""
    B, D = x.shape
    H1 = prepared["w1"].shape[1]        # 128
    H2 = prepared["w2"].shape[1]        # 64
    Cp = prepared["w3"].shape[1]        # round_up(num_classes, 128)
    C = num_classes

    # Batch tile: whole batch if it fits in one tile (block == array dims is
    # always legal), otherwise tb-row tiles (multiple of 8) with a partial
    # last block handled by Pallas.
    TB = B if B <= tb else tb
    grid = (pl.cdiv(B, TB),)

    # Streamed activation specs (batch-tiled) + resident weight specs (block 0).
    x_spec = pl.BlockSpec((TB, D), lambda i: (i, 0))
    out_spec = pl.BlockSpec((TB, C), lambda i: (i, 0))
    w1_spec = pl.BlockSpec((D, H1), lambda i: (0, 0))
    b1_spec = pl.BlockSpec((1, H1), lambda i: (0, 0))
    w2_spec = pl.BlockSpec((H1, H2), lambda i: (0, 0))
    b2_spec = pl.BlockSpec((1, H2), lambda i: (0, 0))
    w3_spec = pl.BlockSpec((H2, Cp), lambda i: (0, 0))
    b3_spec = pl.BlockSpec((1, Cp), lambda i: (0, 0))

    flops = 2 * B * (D * H1 + H1 * H2 + H2 * Cp)
    transcendentals = B * Cp
    bytes_accessed = (
        x.size * 4                                                    # f32 x in
        + (prepared["w1"].size + prepared["w2"].size + prepared["w3"].size) * 2
        + (prepared["b1"].size + prepared["b2"].size + prepared["b3"].size) * 4
        + B * C * 4                                                   # f32 probs out
    )

    out = pl.pallas_call(
        _mlp_softmax_kernel,
        out_shape=jax.ShapeDtypeStruct((B, C), jnp.float32),
        grid=grid,
        in_specs=[x_spec, w1_spec, b1_spec, w2_spec, b2_spec, w3_spec, b3_spec],
        out_specs=out_spec,
        compiler_params=pltpu.CompilerParams(
            dimension_semantics=("parallel",)),
        cost_estimate=pl.CostEstimate(
            flops=flops,
            transcendentals=transcendentals,
            bytes_accessed=bytes_accessed),
    )(x, prepared["w1"], prepared["b1"], prepared["w2"], prepared["b2"],
      prepared["w3"], prepared["b3"])

    return out


def init_params(key, input_size, num_classes):
    """Deterministic synthetic parameters matching nn.Linear shapes.

    Weights stored as [in, out] (== PyTorch weight.T); biases as [1, out].
    """
    k1, k2, k3, k4, k5, k6 = jax.random.split(key, 6)

    def uniform_init(k, shape, fan_in):
        bound = 1.0 / jnp.sqrt(fan_in)
        return jax.random.uniform(k, shape, jnp.float32, -bound, bound)

    return {
        "w1": uniform_init(k1, (input_size, 128), input_size),
        "b1": uniform_init(k2, (1, 128), input_size),
        "w2": uniform_init(k3, (128, 64), 128),
        "b2": uniform_init(k4, (1, 64), 128),
        "w3": uniform_init(k5, (64, num_classes), 64),
        "b3": uniform_init(k6, (1, num_classes), 64),
    }


def _reference_forward(x, params):
    """Pure-JAX f32 reference of the PyTorch forward (eval mode)."""
    h1 = jnp.maximum(x @ params["w1"] + params["b1"], 0.0)
    h2 = jnp.maximum(h1 @ params["w2"] + params["b2"], 0.0)
    logits = h2 @ params["w3"] + params["b3"]
    return jax.nn.softmax(logits, axis=1)


if __name__ == "__main__":
    input_size = 32
    num_classes = 8
    batch = 2

    key = jax.random.PRNGKey(0)
    kx, kp = jax.random.split(key)

    x = jax.random.normal(kx, (batch, input_size), jnp.float32)
    params = init_params(kp, input_size, num_classes)

    prepared = prepare_params(params)   # one-time weight cast/pad (not per-call)
    out = sector_classifier_forward(x, prepared, num_classes=num_classes)
    out = jax.block_until_ready(out)

    # sanity: shape, softmax rows sum to 1, matches f32 reference (bf16 MXU tol)
    ref = _reference_forward(x, params)
    assert out.shape == (batch, num_classes)
    assert jnp.allclose(jnp.sum(out, axis=1), 1.0, atol=1e-5)
    assert jnp.allclose(out, ref, atol=2e-2), float(jnp.max(jnp.abs(out - ref)))

    print("KERNEL_OK")
</pallas_src>

<mosaic_0001>
module attributes {stable_mosaic.version = 11 : i64} {
  func.func @_mlp_softmax_kernel(%arg0: i32, %arg1: memref<2x32xf32, #tpu.memory_space<vmem>>, %arg2: memref<32x128xbf16, #tpu.memory_space<vmem>>, %arg3: memref<1x128xf32, #tpu.memory_space<vmem>>, %arg4: memref<128x64xbf16, #tpu.memory_space<vmem>>, %arg5: memref<1x64xf32, #tpu.memory_space<vmem>>, %arg6: memref<64x128xbf16, #tpu.memory_space<vmem>>, %arg7: memref<1x128xf32, #tpu.memory_space<vmem>>, %arg8: memref<2x8xf32, #tpu.memory_space<vmem>>) attributes {dimension_semantics = [#tpu.dimension_semantics<parallel>], iteration_bounds = array<i64: 1>, scalar_prefetch = 0 : i64, scratch_operands = 0 : i64, tpu.core_type = #tpu.core_type<tc>, window_params = [{transform_indices = @transform_0, window_bounds = array<i64: 2, 32>}, {pipeline_mode = #tpu.pipeline_mode<synchronous>, transform_indices = @transform_1, window_bounds = array<i64: 32, 128>}, {pipeline_mode = #tpu.pipeline_mode<synchronous>, transform_indices = @transform_2, window_bounds = array<i64: 1, 128>}, {pipeline_mode = #tpu.pipeline_mode<synchronous>, transform_indices = @transform_3, window_bounds = array<i64: 128, 64>}, {pipeline_mode = #tpu.pipeline_mode<synchronous>, transform_indices = @transform_4, window_bounds = array<i64: 1, 64>}, {pipeline_mode = #tpu.pipeline_mode<synchronous>, transform_indices = @transform_5, window_bounds = array<i64: 64, 128>}, {pipeline_mode = #tpu.pipeline_mode<synchronous>, transform_indices = @transform_6, window_bounds = array<i64: 1, 128>}, {transform_indices = @transform_7, window_bounds = array<i64: 2, 8>}]} {
    %c0 = arith.constant 0 : index
    %c0_0 = arith.constant 0 : index
    %0 = vector.load %arg1[%c0, %c0_0] : memref<2x32xf32, #tpu.memory_space<vmem>>, vector<2x32xf32>
    %1 = arith.truncf %0 : vector<2x32xf32> to vector<2x32xbf16>
    %c0_1 = arith.constant 0 : index
    %c0_2 = arith.constant 0 : index
    %2 = vector.load %arg2[%c0_1, %c0_2] : memref<32x128xbf16, #tpu.memory_space<vmem>>, vector<32x128xbf16>
    %cst = arith.constant dense<0.000000e+00> : vector<2x128xf32>
    %3 = tpu.matmul %1, %2, %cst {dimension_numbers = #tpu.dot_dimension_numbers<[1], [0], [0], [1], [0, 0, 1, 1], [], []>} : vector<2x32xbf16>, vector<32x128xbf16>, vector<2x128xf32> -> vector<2x128xf32>
    %c0_3 = arith.constant 0 : index
    %c0_4 = arith.constant 0 : index
    %4 = vector.load %arg3[%c0_3, %c0_4] : memref<1x128xf32, #tpu.memory_space<vmem>>, vector<1x128xf32>
    %5 = vector.broadcast %4 : vector<1x128xf32> to vector<2x128xf32>
    %6 = arith.addf %3, %5 : vector<2x128xf32>
    %cst_5 = arith.constant 0.000000e+00 : f32
    %7 = vector.broadcast %cst_5 : f32 to vector<2x128xf32>
    %8 = arith.maximumf %6, %7 : vector<2x128xf32>
    %9 = arith.truncf %8 : vector<2x128xf32> to vector<2x128xbf16>
    %c0_6 = arith.constant 0 : index
    %c0_7 = arith.constant 0 : index
    %10 = vector.load %arg4[%c0_6, %c0_7] : memref<128x64xbf16, #tpu.memory_space<vmem>>, vector<128x64xbf16>
    %cst_8 = arith.constant dense<0.000000e+00> : vector<2x64xf32>
    %11 = tpu.matmul %9, %10, %cst_8 {dimension_numbers = #tpu.dot_dimension_numbers<[1], [0], [0], [1], [0, 0, 1, 1], [], []>} : vector<2x128xbf16>, vector<128x64xbf16>, vector<2x64xf32> -> vector<2x64xf32>
    %c0_9 = arith.constant 0 : index
    %c0_10 = arith.constant 0 : index
    %12 = vector.load %arg5[%c0_9, %c0_10] : memref<1x64xf32, #tpu.memory_space<vmem>>, vector<1x64xf32>
    %13 = vector.broadcast %12 : vector<1x64xf32> to vector<2x64xf32>
    %14 = arith.addf %11, %13 : vector<2x64xf32>
    %cst_11 = arith.constant 0.000000e+00 : f32
    %15 = vector.broadcast %cst_11 : f32 to vector<2x64xf32>
    %16 = arith.maximumf %14, %15 : vector<2x64xf32>
    %17 = arith.truncf %16 : vector<2x64xf32> to vector<2x64xbf16>
    %c0_12 = arith.constant 0 : index
    %c0_13 = arith.constant 0 : index
    %18 = vector.load %arg6[%c0_12, %c0_13] : memref<64x128xbf16, #tpu.memory_space<vmem>>, vector<64x128xbf16>
    %cst_14 = arith.constant dense<0.000000e+00> : vector<2x128xf32>
    %19 = tpu.matmul %17, %18, %cst_14 {dimension_numbers = #tpu.dot_dimension_numbers<[1], [0], [0], [1], [0, 0, 1, 1], [], []>} : vector<2x64xbf16>, vector<64x128xbf16>, vector<2x128xf32> -> vector<2x128xf32>
    %c0_15 = arith.constant 0 : index
    %c0_16 = arith.constant 0 : index
    %20 = vector.load %arg7[%c0_15, %c0_16] : memref<1x128xf32, #tpu.memory_space<vmem>>, vector<1x128xf32>
    %21 = vector.broadcast %20 : vector<1x128xf32> to vector<2x128xf32>
    %22 = arith.addf %19, %21 : vector<2x128xf32>
    %cst_17 = arith.constant dense<0xFF800000> : vector<2xf32>
    %23 = vector.multi_reduction <maximumf>, %22, %cst_17 [1] : vector<2x128xf32> to vector<2xf32>
    %24 = vector.shape_cast %23 : vector<2xf32> to vector<2x1xf32>
    %25 = vector.broadcast %24 : vector<2x1xf32> to vector<2x128xf32>
    %26 = arith.subf %22, %25 : vector<2x128xf32>
    %27 = math.exp %26 : vector<2x128xf32>
    %cst_18 = arith.constant dense<0.000000e+00> : vector<2xf32>
    %28 = vector.multi_reduction <add>, %27, %cst_18 [1] : vector<2x128xf32> to vector<2xf32>
    %29 = vector.shape_cast %28 : vector<2xf32> to vector<2x1xf32>
    %30 = vector.broadcast %29 : vector<2x1xf32> to vector<2x128xf32>
    %31 = arith.divf %27, %30 : vector<2x128xf32>
    %32 = vector.extract_strided_slice %31 {offsets = [0, 0], sizes = [2, 8], strides = [1, 1]} : vector<2x128xf32> to vector<2x8xf32>
    %c0_19 = arith.constant 0 : index
    %c0_20 = arith.constant 0 : index
    %33 = vector.load %arg8[%c0_19, %c0_20] : memref<2x8xf32, #tpu.memory_space<vmem>>, vector<2x8xf32>
    tpu.vector_store %arg8[%c0_19, %c0_20], %32 {strides = array<i32>} : memref<2x8xf32, #tpu.memory_space<vmem>>, vector<2x8xf32>,
    return
  }
  func.func @transform_0(%arg0: i32) -> (i32, i32) {
    %c0_i32 = arith.constant 0 : i32
    %c0_i32_0 = arith.constant 0 : i32
    return %arg0, %c0_i32 : i32, i32
  }
  func.func @transform_1(%arg0: i32) -> (i32, i32) {
    %c0_i32 = arith.constant 0 : i32
    %c0_i32_0 = arith.constant 0 : i32
    %c0_i32_1 = arith.constant 0 : i32
    return %c0_i32, %c0_i32_0 : i32, i32
  }
  func.func @transform_2(%arg0: i32) -> (i32, i32) {
    %c0_i32 = arith.constant 0 : i32
    %c0_i32_0 = arith.constant 0 : i32
    %c0_i32_1 = arith.constant 0 : i32
    return %c0_i32, %c0_i32_0 : i32, i32
  }
  func.func @transform_3(%arg0: i32) -> (i32, i32) {
    %c0_i32 = arith.constant 0 : i32
    %c0_i32_0 = arith.constant 0 : i32
    %c0_i32_1 = arith.constant 0 : i32
    return %c0_i32, %c0_i32_0 : i32, i32
  }
  func.func @transform_4(%arg0: i32) -> (i32, i32) {
    %c0_i32 = arith.constant 0 : i32
    %c0_i32_0 = arith.constant 0 : i32
    %c0_i32_1 = arith.constant 0 : i32
    return %c0_i32, %c0_i32_0 : i32, i32
  }
  func.func @transform_5(%arg0: i32) -> (i32, i32) {
    %c0_i32 = arith.constant 0 : i32
    %c0_i32_0 = arith.constant 0 : i32
    %c0_i32_1 = arith.constant 0 : i32
    return %c0_i32, %c0_i32_0 : i32, i32
  }
  func.func @transform_6(%arg0: i32) -> (i32, i32) {
    %c0_i32 = arith.constant 0 : i32
    %c0_i32_0 = arith.constant 0 : i32
    %c0_i32_1 = arith.constant 0 : i32
    return %c0_i32, %c0_i32_0 : i32, i32
  }
  func.func @transform_7(%arg0: i32) -> (i32, i32) {
    %c0_i32 = arith.constant 0 : i32
    %c0_i32_0 = arith.constant 0 : i32
    return %arg0, %c0_i32 : i32, i32
  }
}

</mosaic_0001>

<bundles_post_ra>
// kernel: sector_classifier_forward.1
= control target key start
LH: loop header
LB: loop body
LE: loop exit
PB: predicated region body
PF: predicated region fallthrough
CT: control target
= control target key end

     0   :  { %v444_v1 = vmov 0.0   ;;  %vm445_vm0 = vmmov 0   ;;  %vm53_vm1 = vcmask 261120   ;;  %s556_s0 = inlined_call_operand.vmem [shape: f32[2,32], index: 0, kind: input, shape index: {}]   ;;  %s557_s1 = inlined_call_operand.vmem [shape: bf16[32,128], index: 1, kind: input, shape index: {}]   ;;  %s558_s2 = inlined_call_operand.vmem [shape: f32[1,128], index: 2, kind: input, shape index: {}]   ;;  %s559_s3 = inlined_call_operand.vmem [shape: bf16[128,64], index: 3, kind: input, shape index: {}]   ;;  %s560_s4 = inlined_call_operand.vmem [shape: f32[1,64], index: 4, kind: input, shape index: {}]   ;;  %s561_s5 = inlined_call_operand.vmem [shape: bf16[64,128], index: 5, kind: input, shape index: {}]   ;;  %s562_s6 = inlined_call_operand.vmem [shape: f32[1,128], index: 6, kind: input, shape index: {}]   ;;  %s563_s7 = inlined_call_operand.hbm [shape: f32[2,8], index: 7, kind: output, shape index: {}]  }
   0x1   :  { %v402_v0 = vld [vmem:[%s557_s1] sm:$0xff]   ;;  %359 = vmatprep.subr.bf16.mxu0 %v444_v1  ;;  %v403_v2 = vld [vmem:[%s557_s1 + $0x8] sm:$0xff]   ;;  %367 = vmatprep.subr.bf16.mxu1 %v444_v1  ;;  %v406_v7 = vld [vmem:[%s559_s3 + $0x10] sm:$0xff]  }
   0x2   :  { %360 = vmatpush3.bf16.msra.mxu0 %v402_v0  ;;  %363 = vmatprep.mubr.msk.bf16.mxu0 %vm445_vm0, %v444_v1  ;;  %v28_v3 = vld [vmem:[%s556_s0] sm:$0x3]  ;;  %v405_v5 = vld [vmem:[%s559_s3 + $0x8] sm:$0xff]   ;;  %v407_v8 = vld [vmem:[%s559_s3 + $0x18] sm:$0xff]  }
   0x3   :  { %v404_v4 = vld [vmem:[%s559_s3] sm:$0xff]   ;;  %361 = vmatprep.subr.bf16.mxu0 %v444_v1  ;;  %383 = vmatprep.mubr.msk.bf16.mxu1 %vm445_vm0, %v444_v1  ;;  %v29_v6 = vpack.c.bf16 %v28_v3, %v28_v3 }
   0x4   :  { %368 = vmatpush3.bf16.msra.mxu1 %v404_v4 }
   0x5   :  { %369 = vmatprep.subr.bf16.mxu1 %v444_v1 }
   0x6   :  { %362 = vmatpush3.bf16.msra.mxu0 %v403_v2 }
   0x7   :  { %387 = vmatprep.subr.bf16.mxu0 %v444_v1 }
   0x8   :  { %370 = vmatpush3.bf16.msra.mxu1 %v405_v5 }
   0x9   :  { %364 = vmatmul.mubr.msk.bf16.vlgmr.msra.gmra.mrb[0].mxu0 %vm53_vm1, %v29_v6  ;;  %371 = vmatprep.subr.bf16.mxu1 %v444_v1 }
   0xa   :  { %395 = vmatprep.mubr.msk.bf16.mxu0 %vm445_vm0, %v444_v1 }
   0xc   :  { %372 = vmatpush3.bf16.msra.mxu1 %v406_v7 }
   0xd   :  { %12 = vsyncpa [#allocation3], 0  ;;  %373 = vmatprep.subr.bf16.mxu1 %v444_v1  ;;  %v408_v9 = vld [vmem:[%s559_s3 + $0x20] sm:$0xff]   ;;  %v409_v10 = vld [vmem:[%s559_s3 + $0x28] sm:$0xff]   ;;  %vm251_vm2 = vcmask 523264   ;;  %vm295_vm3 = vcmask 1041408  }
   0xe   :  { %v410_v11 = vld [vmem:[%s559_s3 + $0x30] sm:$0xff]   ;;  %v411_v12 = vld [vmem:[%s559_s3 + $0x38] sm:$0xff]   ;;  %v412_v13 = vld [vmem:[%s561_s5] sm:$0xff]   ;;  %vm307_vm4 = vcmask 58368  }
   0xf   :  { %388 = vmatpush3.bf16.msra.mxu0 %v412_v13  ;;  %v413_v14 = vld [vmem:[%s561_s5 + $0x8] sm:$0xff]   ;;  %v323_v15 = vld [vmem:[%s558_s2] ss:$0 sm:$0xff]  ;;  %v414_v23 = vld [vmem:[%s561_s5 + $0x10] sm:$0xff]  }
  0x10   :  { %374 = vmatpush3.bf16.msra.mxu1 %v407_v8  ;;  %389 = vmatprep.subr.bf16.mxu0 %v444_v1  ;;  %v415_v24 = vld [vmem:[%s561_s5 + $0x18] sm:$0xff]   ;;  %v327_v25 = vld [vmem:[%s560_s4] ss:$0 sm:$0xff]  ;;  %s446_s4 = smov [#allocation2]  }
  0x11   :  { %375 = vmatprep.subr.bf16.mxu1 %v444_v1  ;;  %v336_v33 = vld [vmem:[%s562_s6] ss:$0 sm:$0xff]  ;;  %s315_s5 = sshll.u32 %s446_s4, 4  ;;  %s316_s5 = int_to_ptr.vmem [resolvable:$true] %s315_s5 }
  0x12   :  { %s420_s6 = scalar_lea.vmem %s316_s5, 32  ;;  %p425_p1 = scmp.lt.s32.totalorder %s316_s5, %s316_s5 }
  0x13   :  { %390 = vmatpush3.bf16.msra.mxu0 %v413_v14  ;;  %p421_p0 = scmp.ne.s32.totalorder %s316_s5, %s420_s6  ;;  %p426_p2 = scmp.lt.s32.totalorder %s420_s6, %s420_s6 }
  0x14   :  { %376 = vmatpush3.bf16.msra.mxu1 %v408_v9  ;;  %391 = vmatprep.subr.bf16.mxu0 %v444_v1 }
  0x15   :  { %377 = vmatprep.subr.bf16.mxu1 %v444_v1  ;;  %p427_p3 = por %p426_p2, %p425_p1 }
  0x17   :  { %392 = vmatpush3.bf16.msra.mxu0 %v414_v23  ;;  %p428_p4 = pnand %p427_p3, %p421_p0 }
  0x18   :  { %378 = vmatpush3.bf16.msra.mxu1 %v409_v10  ;;  %393 = vmatprep.subr.bf16.mxu0 %v444_v1 }
  0x19   :  { %379 = vmatprep.subr.bf16.mxu1 %v444_v1 }
  0x1b   :  { %394 = vmatpush3.bf16.msra.mxu0 %v415_v24 }
  0x1c   :  { %380 = vmatpush3.bf16.msra.mxu1 %v410_v11 }
  0x1d   :  { %381 = vmatprep.subr.bf16.mxu1 %v444_v1 }
  0x20   :  { %382 = vmatpush3.bf16.msra.mxu1 %v411_v12 }
  0xdc   :  { %v91_v16 = vpop.f32.mrb[0].mxu0 }
  0xdd   :  { %v92_v17 = vadd.f32 %v323_v15, %v91_v16  ;;  %v365_v18 = vpop.f32.mrb[1].mxu0 }
  0xde   :  { %v94_v19 = vpop.f32.mrb[2].mxu0 }
  0xdf   :  { %v97_v20 = vmax.f32 %v92_v17, 0.0  ;;  %v366_v21 = vpop.f32.mrb[3].mxu0 }
  0xe1   :  { %v98_v22 = vpack.c.bf16 %v97_v20, %v97_v20 }
  0xe3   :  { %384 = vmatmul.mubr.bf16.vlgmr.msra.gmra.mrb[0].mxu1 %v98_v22 }
 0x1b6   :  { %v204_v26 = vpop.f32.mrb[0].mxu1 }
 0x1b7   :  { %v205_v27 = vadd.f32 %v327_v25, %v204_v26  ;;  %v385_v28 = vpop.f32.mrb[1].mxu1 }
 0x1b8   :  { %v207_v29 = vpop.f32.mrb[2].mxu1 }
 0x1b9   :  { %v210_v30 = vmax.f32 %v205_v27, 0.0  ;;  %v386_v31 = vpop.f32.mrb[3].mxu1 }
 0x1bb   :  { %v211_v32 = vpack.c.bf16 %v210_v30, %v210_v30 }
 0x1bd   :  { %396 = vmatmul.mubr.msk.bf16.vlgmr.msra.gmra.mrb[4].mxu0 %vm251_vm2, %v211_v32 }
 0x290   :  { %v289_v34 = vpop.f32.mrb[4].mxu0 }
 0x291   :  { %v290_v35 = vadd.f32 %v336_v33, %v289_v34  ;;  %v397_v36 = vpop.f32.mrb[5].mxu0 }
 0x292   :  { %v292_v37 = vpop.f32.mrb[6].mxu0 }
 0x293   :  { %v398_v38 = vpop.f32.mrb[7].mxu0  ;;  %v296_v39 = vsel %vm295_vm3, %v290_v35, -inf }
 0x294   :  { %297 = vmax.xlane.f32.xlu0 %v296_v39 }
 0x321   :  { %v298_v40 = vpop.xlane.xlu0 %297 }
 0x322   :  { %v299_v41 = vsub.f32 %v290_v35, %v298_v40 }
 0x324   :  { %v300_v42 = vmul.f32 1.442695, %v299_v41 }
 0x326   :  { %416 = vpow2.f32 %v300_v42 }
 0x330   :  { %v417_v43 = vpop.eup %416 }
 0x331   :  { %v302_v44 = vsel %vm295_vm3, %v417_v43, 0.0 }
 0x332   :  { %303 = vadd.xlane.f32.xlu0 %v302_v44 }
 0x3bf   :  { %v304_v45 = vpop.xlane.xlu0 %303 }
 0x3c0   :  { %418 = vrcp.f32 %v304_v45 }
 0x3ca   :  { %v419_v46 = vpop.eup %418 }
 0x3cb   :  { %v306_v47 = vmul.f32 %v419_v46, %v417_v43 }
 0x3cd   :  { %308 = vst.msk [vmem:[#allocation2] sm:$0x3] %vm307_vm4, %v306_v47 }
 0x3ce   :  { %431 = shalt.err (!%p428_p4)
}
 0x3cf   :  { %s432_s0 = scalar_lea.hbm %s563_s7, 32 }
 0x3d0   :  { %p433_p5 = scmp.ne.s32.totalorder %s563_s7, %s432_s0  ;;  %p436_p6 = scmp.lt.u32.totalorder %s432_s0, %s563_s7 }
 0x3d2   :  { %p438_p7 = pnand %p436_p6, %p433_p5 }
 0x3d4   :  { %441 = shalt.err (!%p438_p7)
}
 0x3d5   :  { %318 = dma.vmem_to_hbm [thread:$0]  %s316_s5, 32, %s563_s7, [#allocation3]  }
 0x3d6   :  { %442 = dma.done.wait [#allocation3], 32  }
 0x3d7   :  { %443 = vsyncadd [#allocation3], 4294967264 }
 0x3d8   :  { %322 = vsyncpa [#allocation3], 1 }

</bundles_post_ra>
